<compile_context>
chip_gen: v6e
topology: v6e:2x2x1
jax: 0.10.0
libtpu: 0.0.40
codegen_flags: <defaults>
</compile_context>

<pallas_src>
import jax
import jax.numpy as jnp
from jax import lax
from jax.experimental import pallas as pl
from jax.experimental.pallas import tpu as pltpu


def _round_up(x, m):
    return ((x + m - 1) // m) * m


def _vmem_params():
    """(per-step tile budget, scoped vmem limit) chosen per TPU generation."""
    cap = 64 * 1024 * 1024
    try:
        info = pltpu.get_tpu_info()
        cap = int(getattr(info, "vmem_capacity_bytes", cap))
    except Exception:
        pass
    if cap >= 96 * 1024 * 1024:
        # v5e / v6e: 128 MiB physical VMEM -> large tiles, raised scoped limit.
        return 40 * 1024 * 1024, 96 * 1024 * 1024
    # v7x (64 MiB physical) or unknown: keep headroom for compiler scratch.
    return 16 * 1024 * 1024, 44 * 1024 * 1024


def _choose_mode_tile(batch, cin, cout, m_pad, tile_budget):
    """Largest 128-multiple divisor of m_pad whose double-buffered working set fits the
    budget; prefers >=2 grid blocks so the parallel axis can split across v7x's 2 TCs."""
    bytes_per_mode = 4 * (2 * batch * cin        # x tile (real + imag)
                          + 2 * cin * cout       # weight tile (wr, wi)
                          + 2 * cout             # bias tile
                          + 2 * batch * cout)    # output tile
    bytes_per_mode *= 2                          # double-buffered by the Pallas pipeline
    n128 = m_pad // 128
    cands = sorted({d for d in range(1, n128 + 1) if n128 % d == 0}, reverse=True)
    if n128 >= 2:
        halved = [d for d in cands if d <= n128 // 2]
        cands = halved if halved else cands
    for d in cands:
        if d * 128 * bytes_per_mode <= tile_budget:
            return d * 128
    return 128


def _vpu_complex_mix(x_ref, w_ref):
    """4-mult complex channel mix on the VPU, vectorized across the mode (lane) axis.

    x_ref block: (2, B, Cin, Tm), w_ref block: (2, Cin, Cout, Tm).
    Returns (yr, yi), each (B, Cout, Tm) float32.
    """
    xr = x_ref[0]            # (B, Cin, Tm)
    xi = x_ref[1]
    wr = w_ref[0]            # (Cin, Cout, Tm)
    wi = w_ref[1]
    cin = wr.shape[0]

    # TODO(synk): for Cin/Cout >= 128 an MXU (or fused truncated-DFT) formulation would
    # beat this Cin-length VPU FMA chain; typical FNO channel counts (<=64) are VPU-friendly.
    xr0 = xr[:, 0:1, :]      # (B, 1, Tm)
    xi0 = xi[:, 0:1, :]
    wr0 = wr[0:1]            # (1, Cout, Tm)
    wi0 = wi[0:1]
    yr = xr0 * wr0 - xi0 * wi0
    yi = xr0 * wi0 + xi0 * wr0
    for i in range(1, cin):
        xri = xr[:, i:i + 1, :]
        xii = xi[:, i:i + 1, :]
        wri = wr[i:i + 1]
        wii = wi[i:i + 1]
        yr = yr + xri * wri - xii * wii
        yi = yi + xri * wii + xii * wri
    return yr, yi


def _mix_kernel(x_ref, w_ref, o_ref):
    yr, yi = _vpu_complex_mix(x_ref, w_ref)
    o_ref[0] = yr
    o_ref[1] = yi


def _mix_bias_kernel(x_ref, w_ref, b_ref, o_ref):
    yr, yi = _vpu_complex_mix(x_ref, w_ref)
    o_ref[0] = yr + b_ref[0][None, :, :]
    o_ref[1] = yi + b_ref[1][None, :, :]


def _fourier_mix(x_stack, w_stack, b_stack, mode_tile, vmem_limit):
    """x_stack (2,B,Cin,Mpad), w_stack (2,Cin,Cout,Mpad), b_stack (2,Cout,Mpad) or None
    -> (2,B,Cout,Mpad) float32."""
    _, batch, cin, m_pad = x_stack.shape
    cout = w_stack.shape[2]
    grid = (m_pad // mode_tile,)

    x_spec = pl.BlockSpec((2, batch, cin, mode_tile), lambda m: (0, 0, 0, m))
    w_spec = pl.BlockSpec((2, cin, cout, mode_tile), lambda m: (0, 0, 0, m))
    o_spec = pl.BlockSpec((2, batch, cout, mode_tile), lambda m: (0, 0, 0, m))
    out_shape = jax.ShapeDtypeStruct((2, batch, cout, m_pad), jnp.float32)
    cparams = pltpu.CompilerParams(
        dimension_semantics=("parallel",),      # mode blocks are independent
        vmem_limit_bytes=vmem_limit,
    )
    if b_stack is not None:
        b_spec = pl.BlockSpec((2, cout, mode_tile), lambda m: (0, 0, m))
        return pl.pallas_call(
            _mix_bias_kernel, out_shape=out_shape, grid=grid,
            in_specs=[x_spec, w_spec, b_spec], out_specs=o_spec,
            compiler_params=cparams,
        )(x_stack, w_stack, b_stack)
    return pl.pallas_call(
        _mix_kernel, out_shape=out_shape, grid=grid,
        in_specs=[x_spec, w_spec], out_specs=o_spec,
        compiler_params=cparams,
    )(x_stack, w_stack)


class FourierConv1d:
    """JAX/Pallas re-implementation of the PyTorch FourierConv1d module."""

    def __init__(self, in_channels, out_channels, size, key, bias=True, periodic=False):
        self.in_channels = in_channels
        self.out_channels = out_channels
        self.size = size if not periodic else size // 2
        self.bias = bias
        self.periodic = periodic

        k1, k2, k3, k4 = jax.random.split(key, 4)
        sw = 1.0 / (in_channels * out_channels)
        self.w_real = sw * jax.random.uniform(k1, (in_channels, out_channels, self.size), jnp.float32)
        self.w_imag = sw * jax.random.uniform(k2, (in_channels, out_channels, self.size), jnp.float32)
        sb = 1.0 / out_channels
        self.b_real = sb * jax.random.uniform(k3, (out_channels, self.size), jnp.float32)
        self.b_imag = sb * jax.random.uniform(k4, (out_channels, self.size), jnp.float32)

        # Kernel-ready parameters: mode axis stays last (lane dim), real/imag stacked so
        # each operand is one DMA stream; only 2 weight planes hit HBM. Padded once to a
        # 128-multiple so the kernel always runs full, unmasked vregs.
        self._m_pad = _round_up(self.size, 128)
        extra = self._m_pad - self.size
        w_stack = jnp.stack([self.w_real, self.w_imag])          # (2, Cin, Cout, M)
        b_stack = jnp.stack([self.b_real, self.b_imag])          # (2, Cout, M)
        if extra:
            w_stack = jnp.pad(w_stack, ((0, 0), (0, 0), (0, 0), (0, extra)))
            b_stack = jnp.pad(b_stack, ((0, 0), (0, 0), (0, extra)))
        self._w_stack = w_stack
        self._b_stack = b_stack

    def __call__(self, x):
        x = jnp.asarray(x, jnp.float32)
        batch = x.shape[0]
        if not self.periodic:
            padding = self.size
            x = jnp.pad(x, ((0, 0), (0, 0), (0, padding)))
        n_full = x.shape[-1]

        # TODO(synk): rfft/irfft have no Pallas TPU primitive; they stay XLA glue. Fusing a
        # truncated-DFT matmul into the same mode grid would feed the MXU and delete this glue.
        x_ft = jnp.fft.rfft(x, axis=-1)                          # (B, Cin, n//2+1) complex64
        modes = self.size
        xm = x_ft[:, :, :modes]
        x_stack = jnp.stack([jnp.real(xm), jnp.imag(xm)])        # (2, B, Cin, M) f32, mode-last
        m_pad = self._m_pad
        if m_pad > modes:
            x_stack = jnp.pad(x_stack, ((0, 0), (0, 0), (0, 0), (0, m_pad - modes)))

        tile_budget, vmem_limit = _vmem_params()
        mode_tile = _choose_mode_tile(batch, self.in_channels, self.out_channels,
                                      m_pad, tile_budget)
        b_stack = self._b_stack if self.bias else None
        y = _fourier_mix(x_stack, self._w_stack, b_stack, mode_tile, vmem_limit)  # (2,B,Cout,Mpad)

        n_freq = n_full // 2 + 1
        y_c = lax.complex(y[0, :, :, :modes], y[1, :, :, :modes])  # (B, Cout, M)
        out_ft = jnp.zeros((batch, self.out_channels, n_freq), jnp.complex64)
        out_ft = out_ft.at[:, :, :modes].set(y_c)
        out = jnp.fft.irfft(out_ft, n=n_full, axis=-1)
        if not self.periodic:
            out = out[..., :-padding]
        return out.astype(jnp.float32)


def _reference_forward(layer, x):
    """Pure-JAX (no Pallas) forward pass for checking."""
    xx = jnp.asarray(x, jnp.float32)
    if not layer.periodic:
        xx = jnp.pad(xx, ((0, 0), (0, 0), (0, layer.size)))
    x_ft = jnp.fft.rfft(xx, axis=-1)
    w_c = layer.w_real + 1j * layer.w_imag
    modes = jnp.einsum('bix,iox->box', x_ft[:, :, :layer.size], w_c,
                       precision=lax.Precision.HIGHEST)
    if layer.bias:
        modes = modes + (layer.b_real + 1j * layer.b_imag)
    n_full = xx.shape[-1]
    out_ft = jnp.zeros((xx.shape[0], layer.out_channels, n_full // 2 + 1), jnp.complex64)
    out_ft = out_ft.at[:, :, :layer.size].set(modes)
    out = jnp.fft.irfft(out_ft, n=n_full, axis=-1)
    if not layer.periodic:
        out = out[..., :-layer.size]
    return out.astype(jnp.float32)


if __name__ == "__main__":
    key = jax.random.PRNGKey(0)
    kp1, kp2, kx = jax.random.split(key, 3)

    B, C, L = 2, 4, 16          # in_channels == out_channels, as the torch usage requires
    x = jax.random.normal(kx, (B, C, L), jnp.float32)

    # bias=True path
    layer = FourierConv1d(C, C, L, kp1, bias=True, periodic=False)
    out = layer(x)
    jax.block_until_ready(out)
    ref = _reference_forward(layer, x)
    assert out.shape == (B, C, L)
    assert jnp.allclose(out, ref, atol=1e-4, rtol=1e-4), "bias=True mismatch vs JAX reference"

    # bias=False path (exercises the bias-free kernel variant)
    layer_nb = FourierConv1d(C, C, L, kp2, bias=False, periodic=False)
    out_nb = layer_nb(x)
    jax.block_until_ready(out_nb)
    ref_nb = _reference_forward(layer_nb, x)
    assert jnp.allclose(out_nb, ref_nb, atol=1e-4, rtol=1e-4), "bias=False mismatch vs JAX reference"

    print("KERNEL_OK")
</pallas_src>

<mosaic_0001>
module attributes {stable_mosaic.version = 11 : i64} {
  func.func @_mix_bias_kernel(%arg0: i32, %arg1: memref<2x2x4x128xf32, #tpu.memory_space<vmem>>, %arg2: memref<2x4x4x128xf32, #tpu.memory_space<vmem>>, %arg3: memref<2x4x128xf32, #tpu.memory_space<vmem>>, %arg4: memref<2x2x4x128xf32, #tpu.memory_space<vmem>>) attributes {dimension_semantics = [#tpu.dimension_semantics<parallel>], iteration_bounds = array<i64: 1>, scalar_prefetch = 0 : i64, scratch_operands = 0 : i64, tpu.core_type = #tpu.core_type<tc>, window_params = [{transform_indices = @transform_0, window_bounds = array<i64: 2, 2, 4, 128>}, {transform_indices = @transform_1, window_bounds = array<i64: 2, 4, 4, 128>}, {transform_indices = @transform_2, window_bounds = array<i64: 2, 4, 128>}, {transform_indices = @transform_3, window_bounds = array<i64: 2, 2, 4, 128>}]} {
    %c0 = arith.constant 0 : index
    %c0_0 = arith.constant 0 : index
    %c0_1 = arith.constant 0 : index
    %c0_2 = arith.constant 0 : index
    %0 = vector.load %arg1[%c0, %c0_0, %c0_1, %c0_2] : memref<2x2x4x128xf32, #tpu.memory_space<vmem>>, vector<1x2x4x128xf32>
    %1 = vector.shape_cast %0 : vector<1x2x4x128xf32> to vector<2x4x128xf32>
    %c1 = arith.constant 1 : index
    %c0_3 = arith.constant 0 : index
    %c0_4 = arith.constant 0 : index
    %c0_5 = arith.constant 0 : index
    %2 = vector.load %arg1[%c1, %c0_3, %c0_4, %c0_5] : memref<2x2x4x128xf32, #tpu.memory_space<vmem>>, vector<1x2x4x128xf32>
    %3 = vector.shape_cast %2 : vector<1x2x4x128xf32> to vector<2x4x128xf32>
    %c0_6 = arith.constant 0 : index
    %c0_7 = arith.constant 0 : index
    %c0_8 = arith.constant 0 : index
    %c0_9 = arith.constant 0 : index
    %4 = vector.load %arg2[%c0_6, %c0_7, %c0_8, %c0_9] : memref<2x4x4x128xf32, #tpu.memory_space<vmem>>, vector<1x4x4x128xf32>
    %5 = vector.shape_cast %4 : vector<1x4x4x128xf32> to vector<4x4x128xf32>
    %c1_10 = arith.constant 1 : index
    %c0_11 = arith.constant 0 : index
    %c0_12 = arith.constant 0 : index
    %c0_13 = arith.constant 0 : index
    %6 = vector.load %arg2[%c1_10, %c0_11, %c0_12, %c0_13] : memref<2x4x4x128xf32, #tpu.memory_space<vmem>>, vector<1x4x4x128xf32>
    %7 = vector.shape_cast %6 : vector<1x4x4x128xf32> to vector<4x4x128xf32>
    %8 = vector.extract_strided_slice %1 {offsets = [0, 0, 0], sizes = [2, 1, 128], strides = [1, 1, 1]} : vector<2x4x128xf32> to vector<2x1x128xf32>
    %9 = vector.extract_strided_slice %3 {offsets = [0, 0, 0], sizes = [2, 1, 128], strides = [1, 1, 1]} : vector<2x4x128xf32> to vector<2x1x128xf32>
    %10 = vector.extract_strided_slice %5 {offsets = [0, 0, 0], sizes = [1, 4, 128], strides = [1, 1, 1]} : vector<4x4x128xf32> to vector<1x4x128xf32>
    %11 = vector.extract_strided_slice %7 {offsets = [0, 0, 0], sizes = [1, 4, 128], strides = [1, 1, 1]} : vector<4x4x128xf32> to vector<1x4x128xf32>
    %12 = vector.broadcast %8 : vector<2x1x128xf32> to vector<2x4x128xf32>
    %13 = vector.broadcast %10 : vector<1x4x128xf32> to vector<2x4x128xf32>
    %14 = arith.mulf %12, %13 : vector<2x4x128xf32>
    %15 = vector.broadcast %9 : vector<2x1x128xf32> to vector<2x4x128xf32>
    %16 = vector.broadcast %11 : vector<1x4x128xf32> to vector<2x4x128xf32>
    %17 = arith.mulf %15, %16 : vector<2x4x128xf32>
    %18 = arith.subf %14, %17 : vector<2x4x128xf32>
    %19 = vector.broadcast %8 : vector<2x1x128xf32> to vector<2x4x128xf32>
    %20 = vector.broadcast %11 : vector<1x4x128xf32> to vector<2x4x128xf32>
    %21 = arith.mulf %19, %20 : vector<2x4x128xf32>
    %22 = vector.broadcast %9 : vector<2x1x128xf32> to vector<2x4x128xf32>
    %23 = vector.broadcast %10 : vector<1x4x128xf32> to vector<2x4x128xf32>
    %24 = arith.mulf %22, %23 : vector<2x4x128xf32>
    %25 = arith.addf %21, %24 : vector<2x4x128xf32>
    %26 = vector.extract_strided_slice %1 {offsets = [0, 1, 0], sizes = [2, 1, 128], strides = [1, 1, 1]} : vector<2x4x128xf32> to vector<2x1x128xf32>
    %27 = vector.extract_strided_slice %3 {offsets = [0, 1, 0], sizes = [2, 1, 128], strides = [1, 1, 1]} : vector<2x4x128xf32> to vector<2x1x128xf32>
    %28 = vector.extract_strided_slice %5 {offsets = [1, 0, 0], sizes = [1, 4, 128], strides = [1, 1, 1]} : vector<4x4x128xf32> to vector<1x4x128xf32>
    %29 = vector.extract_strided_slice %7 {offsets = [1, 0, 0], sizes = [1, 4, 128], strides = [1, 1, 1]} : vector<4x4x128xf32> to vector<1x4x128xf32>
    %30 = vector.broadcast %26 : vector<2x1x128xf32> to vector<2x4x128xf32>
    %31 = vector.broadcast %28 : vector<1x4x128xf32> to vector<2x4x128xf32>
    %32 = arith.mulf %30, %31 : vector<2x4x128xf32>
    %33 = arith.addf %18, %32 : vector<2x4x128xf32>
    %34 = vector.broadcast %27 : vector<2x1x128xf32> to vector<2x4x128xf32>
    %35 = vector.broadcast %29 : vector<1x4x128xf32> to vector<2x4x128xf32>
    %36 = arith.mulf %34, %35 : vector<2x4x128xf32>
    %37 = arith.subf %33, %36 : vector<2x4x128xf32>
    %38 = vector.broadcast %26 : vector<2x1x128xf32> to vector<2x4x128xf32>
    %39 = vector.broadcast %29 : vector<1x4x128xf32> to vector<2x4x128xf32>
    %40 = arith.mulf %38, %39 : vector<2x4x128xf32>
    %41 = arith.addf %25, %40 : vector<2x4x128xf32>
    %42 = vector.broadcast %27 : vector<2x1x128xf32> to vector<2x4x128xf32>
    %43 = vector.broadcast %28 : vector<1x4x128xf32> to vector<2x4x128xf32>
    %44 = arith.mulf %42, %43 : vector<2x4x128xf32>
    %45 = arith.addf %41, %44 : vector<2x4x128xf32>
    %46 = vector.extract_strided_slice %1 {offsets = [0, 2, 0], sizes = [2, 1, 128], strides = [1, 1, 1]} : vector<2x4x128xf32> to vector<2x1x128xf32>
    %47 = vector.extract_strided_slice %3 {offsets = [0, 2, 0], sizes = [2, 1, 128], strides = [1, 1, 1]} : vector<2x4x128xf32> to vector<2x1x128xf32>
    %48 = vector.extract_strided_slice %5 {offsets = [2, 0, 0], sizes = [1, 4, 128], strides = [1, 1, 1]} : vector<4x4x128xf32> to vector<1x4x128xf32>
    %49 = vector.extract_strided_slice %7 {offsets = [2, 0, 0], sizes = [1, 4, 128], strides = [1, 1, 1]} : vector<4x4x128xf32> to vector<1x4x128xf32>
    %50 = vector.broadcast %46 : vector<2x1x128xf32> to vector<2x4x128xf32>
    %51 = vector.broadcast %48 : vector<1x4x128xf32> to vector<2x4x128xf32>
    %52 = arith.mulf %50, %51 : vector<2x4x128xf32>
    %53 = arith.addf %37, %52 : vector<2x4x128xf32>
    %54 = vector.broadcast %47 : vector<2x1x128xf32> to vector<2x4x128xf32>
    %55 = vector.broadcast %49 : vector<1x4x128xf32> to vector<2x4x128xf32>
    %56 = arith.mulf %54, %55 : vector<2x4x128xf32>
    %57 = arith.subf %53, %56 : vector<2x4x128xf32>
    %58 = vector.broadcast %46 : vector<2x1x128xf32> to vector<2x4x128xf32>
    %59 = vector.broadcast %49 : vector<1x4x128xf32> to vector<2x4x128xf32>
    %60 = arith.mulf %58, %59 : vector<2x4x128xf32>
    %61 = arith.addf %45, %60 : vector<2x4x128xf32>
    %62 = vector.broadcast %47 : vector<2x1x128xf32> to vector<2x4x128xf32>
    %63 = vector.broadcast %48 : vector<1x4x128xf32> to vector<2x4x128xf32>
    %64 = arith.mulf %62, %63 : vector<2x4x128xf32>
    %65 = arith.addf %61, %64 : vector<2x4x128xf32>
    %66 = vector.extract_strided_slice %1 {offsets = [0, 3, 0], sizes = [2, 1, 128], strides = [1, 1, 1]} : vector<2x4x128xf32> to vector<2x1x128xf32>
    %67 = vector.extract_strided_slice %3 {offsets = [0, 3, 0], sizes = [2, 1, 128], strides = [1, 1, 1]} : vector<2x4x128xf32> to vector<2x1x128xf32>
    %68 = vector.extract_strided_slice %5 {offsets = [3, 0, 0], sizes = [1, 4, 128], strides = [1, 1, 1]} : vector<4x4x128xf32> to vector<1x4x128xf32>
    %69 = vector.extract_strided_slice %7 {offsets = [3, 0, 0], sizes = [1, 4, 128], strides = [1, 1, 1]} : vector<4x4x128xf32> to vector<1x4x128xf32>
    %70 = vector.broadcast %66 : vector<2x1x128xf32> to vector<2x4x128xf32>
    %71 = vector.broadcast %68 : vector<1x4x128xf32> to vector<2x4x128xf32>
    %72 = arith.mulf %70, %71 : vector<2x4x128xf32>
    %73 = arith.addf %57, %72 : vector<2x4x128xf32>
    %74 = vector.broadcast %67 : vector<2x1x128xf32> to vector<2x4x128xf32>
    %75 = vector.broadcast %69 : vector<1x4x128xf32> to vector<2x4x128xf32>
    %76 = arith.mulf %74, %75 : vector<2x4x128xf32>
    %77 = arith.subf %73, %76 : vector<2x4x128xf32>
    %78 = vector.broadcast %66 : vector<2x1x128xf32> to vector<2x4x128xf32>
    %79 = vector.broadcast %69 : vector<1x4x128xf32> to vector<2x4x128xf32>
    %80 = arith.mulf %78, %79 : vector<2x4x128xf32>
    %81 = arith.addf %65, %80 : vector<2x4x128xf32>
    %82 = vector.broadcast %67 : vector<2x1x128xf32> to vector<2x4x128xf32>
    %83 = vector.broadcast %68 : vector<1x4x128xf32> to vector<2x4x128xf32>
    %84 = arith.mulf %82, %83 : vector<2x4x128xf32>
    %85 = arith.addf %81, %84 : vector<2x4x128xf32>
    %c0_14 = arith.constant 0 : index
    %c0_15 = arith.constant 0 : index
    %c0_16 = arith.constant 0 : index
    %86 = vector.load %arg3[%c0_14, %c0_15, %c0_16] : memref<2x4x128xf32, #tpu.memory_space<vmem>>, vector<1x4x128xf32>
    %87 = vector.shape_cast %86 : vector<1x4x128xf32> to vector<4x128xf32>
    %88 = vector.shape_cast %87 : vector<4x128xf32> to vector<1x4x128xf32>
    %89 = vector.broadcast %88 : vector<1x4x128xf32> to vector<2x4x128xf32>
    %90 = arith.addf %77, %89 : vector<2x4x128xf32>
    %c0_17 = arith.constant 0 : index
    %c0_18 = arith.constant 0 : index
    %c0_19 = arith.constant 0 : index
    %c0_20 = arith.constant 0 : index
    %91 = vector.load %arg4[%c0_17, %c0_18, %c0_19, %c0_20] : memref<2x2x4x128xf32, #tpu.memory_space<vmem>>, vector<1x2x4x128xf32>
    %92 = vector.shape_cast %91 : vector<1x2x4x128xf32> to vector<2x4x128xf32>
    %93 = vector.shape_cast %90 : vector<2x4x128xf32> to vector<1x2x4x128xf32>
    tpu.vector_store %arg4[%c0_17, %c0_18, %c0_19, %c0_20], %93 {strides = array<i32>} : memref<2x2x4x128xf32, #tpu.memory_space<vmem>>, vector<1x2x4x128xf32>,
    %c1_21 = arith.constant 1 : index
    %c0_22 = arith.constant 0 : index
    %c0_23 = arith.constant 0 : index
    %94 = vector.load %arg3[%c1_21, %c0_22, %c0_23] : memref<2x4x128xf32, #tpu.memory_space<vmem>>, vector<1x4x128xf32>
    %95 = vector.shape_cast %94 : vector<1x4x128xf32> to vector<4x128xf32>
    %96 = vector.shape_cast %95 : vector<4x128xf32> to vector<1x4x128xf32>
    %97 = vector.broadcast %96 : vector<1x4x128xf32> to vector<2x4x128xf32>
    %98 = arith.addf %85, %97 : vector<2x4x128xf32>
    %c1_24 = arith.constant 1 : index
    %c0_25 = arith.constant 0 : index
    %c0_26 = arith.constant 0 : index
    %c0_27 = arith.constant 0 : index
    %99 = vector.load %arg4[%c1_24, %c0_25, %c0_26, %c0_27] : memref<2x2x4x128xf32, #tpu.memory_space<vmem>>, vector<1x2x4x128xf32>
    %100 = vector.shape_cast %99 : vector<1x2x4x128xf32> to vector<2x4x128xf32>
    %101 = vector.shape_cast %98 : vector<2x4x128xf32> to vector<1x2x4x128xf32>
    tpu.vector_store %arg4[%c1_24, %c0_25, %c0_26, %c0_27], %101 {strides = array<i32>} : memref<2x2x4x128xf32, #tpu.memory_space<vmem>>, vector<1x2x4x128xf32>,
    return
  }
  func.func @transform_0(%arg0: i32) -> (i32, i32, i32, i32) {
    %c0_i32 = arith.constant 0 : i32
    %c0_i32_0 = arith.constant 0 : i32
    %c0_i32_1 = arith.constant 0 : i32
    %c0_i32_2 = arith.constant 0 : i32
    return %c0_i32, %c0_i32_0, %c0_i32_1, %arg0 : i32, i32, i32, i32
  }
  func.func @transform_1(%arg0: i32) -> (i32, i32, i32, i32) {
    %c0_i32 = arith.constant 0 : i32
    %c0_i32_0 = arith.constant 0 : i32
    %c0_i32_1 = arith.constant 0 : i32
    %c0_i32_2 = arith.constant 0 : i32
    return %c0_i32, %c0_i32_0, %c0_i32_1, %arg0 : i32, i32, i32, i32
  }
  func.func @transform_2(%arg0: i32) -> (i32, i32, i32) {
    %c0_i32 = arith.constant 0 : i32
    %c0_i32_0 = arith.constant 0 : i32
    %c0_i32_1 = arith.constant 0 : i32
    return %c0_i32, %c0_i32_0, %arg0 : i32, i32, i32
  }
  func.func @transform_3(%arg0: i32) -> (i32, i32, i32, i32) {
    %c0_i32 = arith.constant 0 : i32
    %c0_i32_0 = arith.constant 0 : i32
    %c0_i32_1 = arith.constant 0 : i32
    %c0_i32_2 = arith.constant 0 : i32
    return %c0_i32, %c0_i32_0, %c0_i32_1, %arg0 : i32, i32, i32, i32
  }
}

</mosaic_0001>

<bundles_post_ra>
// kernel: tpu_custom_call.1
= control target key start
LH: loop header
LB: loop body
LE: loop exit
PB: predicated region body
PF: predicated region fallthrough
CT: control target
= control target key end

     0   :  { %8 = vsyncpa [#allocation3], 0  ;;  %s378_s0 = inlined_call_operand.hbm [shape: f32[2,2,4,128], index: 0, kind: input, shape index: {}]   ;;  %s379_s1 = inlined_call_operand.hbm [shape: f32[2,4,4,128], index: 1, kind: input, shape index: {}]   ;;  %s380_s2 = inlined_call_operand.hbm [shape: f32[2,4,128], index: 2, kind: input, shape index: {}]   ;;  %s381_s3 = inlined_call_operand.hbm [shape: f32[2,2,4,128], index: 3, kind: output, shape index: {}]  }
   0x1   :  { %9 = vsyncpa [#allocation6], 0 }
   0x2   :  { %10 = vsyncpa [#allocation4], 0  ;;  %s316_s12 = smov [#allocation5]   ;;  %s317_s14 = smov [#allocation2]  }
   0x3   :  { %s28_s13 = sshll.u32 %s316_s12, 4  ;;  %s16_s15 = sshll.u32 %s317_s14, 4  ;;  %s29_s13 = int_to_ptr.vmem [resolvable:$true] %s28_s13  ;;  %s17_s15 = int_to_ptr.vmem [resolvable:$true] %s16_s15 }
   0x4   :  { %s238_s16 = scalar_lea.vmem %s29_s13, 512  ;;  %p243_p1 = scmp.lt.s32.totalorder %s29_s13, %s29_s13 }
   0x5   :  { %p239_p0 = scmp.ne.s32.totalorder %s29_s13, %s238_s16  ;;  %p244_p2 = scmp.lt.s32.totalorder %s238_s16, %s238_s16 }
   0x7   :  { %p245_p3 = por %p244_p2, %p243_p1 }
   0x9   :  { %p246_p4 = pnand %p245_p3, %p239_p0 }
   0xb   :  { %249 = shalt.err (!%p246_p4)
}
   0xc   :  { %s318_s17 = smov 64   ;;  %s319_s18 = smov 4  }
   0xd   :  { %34 = dma.hbm_to_vmem [thread:$0]  %s379_s1, 512, %s29_s13, [#allocation6], %s318_s17, %s318_s17, %s319_s18  }
   0xe   :  { %s258_s21 = scalar_lea.vmem %s17_s15, 256  ;;  %p263_p6 = scmp.lt.s32.totalorder %s17_s15, %s17_s15 }
   0xf   :  { %p259_p5 = scmp.ne.s32.totalorder %s17_s15, %s258_s21  ;;  %p264_p7 = scmp.lt.s32.totalorder %s258_s21, %s258_s21 }
  0x11   :  { %p265_p8 = por %p264_p7, %p263_p6 }
  0x13   :  { %p266_p9 = pnand %p265_p8, %p259_p5 }
  0x15   :  { %269 = shalt.err (!%p266_p9)
}
  0x16   :  { %22 = dma.hbm_to_vmem [thread:$0]  %s378_s0, 256, %s17_s15, [#allocation3], %s318_s17, %s318_s17, %s319_s18  }
  0x17   :  { %s320_s24 = smov [#allocation7]  }
  0x18   :  { %s40_s25 = sshll.u32 %s320_s24, 4  ;;  %s41_s25 = int_to_ptr.vmem [resolvable:$true] %s40_s25 }
  0x19   :  { %s278_s26 = scalar_lea.vmem %s41_s25, 128  ;;  %p283_p11 = scmp.lt.s32.totalorder %s41_s25, %s41_s25 }
  0x1a   :  { %p279_p10 = scmp.ne.s32.totalorder %s41_s25, %s278_s26  ;;  %p284_p12 = scmp.lt.s32.totalorder %s278_s26, %s278_s26 }
  0x1c   :  { %p285_p13 = por %p284_p12, %p283_p11 }
  0x1e   :  { %p286_p0 = pnand %p285_p13, %p279_p10 }
  0x20   :  { %289 = shalt.err (!%p286_p0)
}
  0x21   :  { %46 = dma.hbm_to_vmem [thread:$0]  %s380_s2, 128, %s41_s25, [#allocation6], %s318_s17, %s318_s17, %s319_s18  }
  0x22   :  { %310 = dma.done.wait [#allocation3], 256  }
  0x23   :  { %311 = vsyncadd [#allocation3], 4294967040 }
  0x24   :  { %312 = dma.done.wait [#allocation6], 640  }
  0x25   :  { %313 = vsyncadd [#allocation6], 4294966656  ;;  %v70_v0 = vlaneseq  ;;  %v56_v6 = vld [vmem:[#allocation2] sm:$0xf]  ;;  %v59_v7 = vld [vmem:[#allocation2 + $0x8] sm:$0xf] }
  0x26   :  { %v61_v8 = vld [vmem:[#allocation5] sm:$0xf]  ;;  %v62_v9 = vld [vmem:[#allocation5 + $0x4] sm:$0xf]  ;;  %v66_v14 = vld [vmem:[#allocation5 + $0x10] sm:$0xf] }
  0x27   :  { %v71_v1 = vshrl.u32 %v70_v0, 7  ;;  %v360_v16 = vld [vmem:[#allocation5 + $0x8] sm:$0xf]  ;;  %v67_v17 = vld [vmem:[#allocation5 + $0x14] sm:$0xf]  ;;  %s321_s0 = smov [#allocation8]  }
  0x28   :  { %v57_v21 = vld [vmem:[#allocation2 + $0x4] sm:$0xf]  ;;  %v60_v26 = vld [vmem:[#allocation2 + $0xc] sm:$0xf]  ;;  %v362_v27 = vld [vmem:[#allocation5 + $0xc] sm:$0xf] }
  0x29   :  { %v72_v2 = vsub.s32 0, %v71_v1  ;;  %v100_v3 = vsub.s32 1, %v71_v1  ;;  %v132_v4 = vsub.s32 2, %v71_v1  ;;  %v164_v5 = vsub.s32 3, %v71_v1  ;;  %v68_v36 = vld [vmem:[#allocation5 + $0x18] sm:$0xf] }
  0x2a   :  { %v69_v43 = vld [vmem:[#allocation5 + $0x1c] sm:$0xf]  ;;  %s211_s2 = sshll.u32 %s321_s0, 4  ;;  %s212_s2 = int_to_ptr.vmem [resolvable:$true] %s211_s2 }
  0x2b   :  { %v73_v10 = vrot.slane %v56_v6, %v72_v2  ;;  %v83_v11 = vrot.slane %v59_v7, %v72_v2  ;;  %v101_v12 = vrot.slane %v56_v6, %v100_v3  ;;  %v113_v13 = vrot.slane %v59_v7, %v100_v3  ;;  %s290_s28 = scalar_lea.vmem %s212_s2, 256  ;;  %p295_p2 = scmp.lt.s32.totalorder %s212_s2, %s212_s2 }
  0x2c   :  { %v133_v15 = vrot.slane %v56_v6, %v132_v4  ;;  %v145_v23 = vrot.slane %v59_v7, %v132_v4  ;;  %v165_v24 = vrot.slane %v56_v6, %v164_v5  ;;  %v177_v25 = vrot.slane %v59_v7, %v164_v5  ;;  %p291_p1 = scmp.ne.s32.totalorder %s212_s2, %s290_s28  ;;  %p296_p3 = scmp.lt.s32.totalorder %s290_s28, %s290_s28 }
  0x2d   :  { %v78_v18 = vmul.f32 %v73_v10, %v61_v8  ;;  %v88_v19 = vmul.f32 %v83_v11, %v66_v14  ;;  %v106_v20 = vmul.f32 %v101_v12, %v62_v9  ;;  %v118_v22 = vmul.f32 %v113_v13, %v67_v17 }
  0x2e   :  { %v77_v29 = vrot.slane %v57_v21, %v72_v2  ;;  %v87_v30 = vrot.slane %v60_v26, %v72_v2  ;;  %v105_v31 = vrot.slane %v57_v21, %v100_v3  ;;  %v138_v32 = vmul.f32 %v133_v15, %v360_v16  ;;  %p297_p4 = por %p296_p3, %p295_p2 }
  0x2f   :  { %v90_v28 = vsub.f32 %v78_v18, %v88_v19  ;;  %v117_v33 = vrot.slane %v60_v26, %v100_v3  ;;  %v137_v34 = vrot.slane %v57_v21, %v132_v4  ;;  %v149_v35 = vrot.slane %v60_v26, %v132_v4 }
  0x30   :  { %v79_v38 = vmul.f32 %v77_v29, %v61_v8  ;;  %v89_v39 = vmul.f32 %v87_v30, %v66_v14  ;;  %v107_v40 = vmul.f32 %v105_v31, %v62_v9  ;;  %v150_v41 = vmul.f32 %v145_v23, %v68_v36  ;;  %p298_p5 = pnand %p297_p4, %p291_p1 }
  0x31   :  { %v108_v37 = vadd.f32 %v106_v20, %v90_v28  ;;  %v170_v42 = vmul.f32 %v165_v24, %v362_v27  ;;  %v119_v46 = vmul.f32 %v117_v33, %v67_v17  ;;  %v92_v47 = vmul.f32 %v73_v10, %v66_v14  ;;  %v194_v10 = vld [vmem:[#allocation7] sm:$0xf] }
  0x32   :  { %v91_v45 = vsub.f32 %v79_v38, %v89_v39  ;;  %v182_v48 = vmul.f32 %v177_v25, %v69_v43  ;;  %v169_v49 = vrot.slane %v57_v21, %v164_v5  ;;  %v94_v50 = vmul.f32 %v83_v11, %v61_v8 }
  0x33   :  { %v120_v44 = vsub.f32 %v108_v37, %v118_v22  ;;  %v122_v51 = vmul.f32 %v101_v12, %v67_v17  ;;  %v139_v54 = vmul.f32 %v137_v34, %v360_v16  ;;  %v151_v55 = vmul.f32 %v149_v35, %v68_v36 }
  0x34   :  { %v109_v53 = vadd.f32 %v107_v40, %v91_v45  ;;  %v181_v56 = vrot.slane %v60_v26, %v164_v5  ;;  %v96_v57 = vadd.f32 %v94_v50, %v92_v47  ;;  %v126_v58 = vmul.f32 %v113_v13, %v62_v9 }
  0x35   :  { %v140_v52 = vadd.f32 %v138_v32, %v120_v44  ;;  %v93_v59 = vmul.f32 %v77_v29, %v66_v14  ;;  %v95_v62 = vmul.f32 %v87_v30, %v61_v8  ;;  %v123_v63 = vmul.f32 %v105_v31, %v67_v17  ;;  %v200_v32 = vld [vmem:[#allocation7 + $0x4] sm:$0xf] }
  0x36   :  { %v121_v61 = vsub.f32 %v109_v53, %v119_v46  ;;  %v171_v0 = vmul.f32 %v169_v49, %v362_v27  ;;  %v124_v1 = vadd.f32 %v122_v51, %v96_v57  ;;  %v154_v2 = vmul.f32 %v133_v15, %v68_v36 }
  0x37   :  { %v152_v60 = vsub.f32 %v140_v52, %v150_v41  ;;  %v97_v6 = vadd.f32 %v95_v62, %v93_v59  ;;  %v127_v7 = vmul.f32 %v117_v33, %v62_v9  ;;  %v183_v11 = vmul.f32 %v181_v56, %v69_v43 }
  0x38   :  { %v141_v4 = vadd.f32 %v139_v54, %v121_v61  ;;  %v128_v12 = vadd.f32 %v126_v58, %v124_v1  ;;  %v158_v5 = vmul.f32 %v145_v23, %v360_v16  ;;  %v155_v19 = vmul.f32 %v137_v34, %v68_v36 }
  0x39   :  { %v172_v3 = vadd.f32 %v170_v42, %v152_v60  ;;  %v125_v14 = vadd.f32 %v123_v63, %v97_v6  ;;  %v186_v8 = vmul.f32 %v165_v24, %v69_v43  ;;  %v159_v15 = vmul.f32 %v149_v35, %v360_v16 }
  0x3a   :  { %v153_v13 = vsub.f32 %v141_v4, %v151_v55  ;;  %v156_v20 = vadd.f32 %v154_v2, %v128_v12  ;;  %v190_v28 = vmul.f32 %v177_v25, %v362_v27  ;;  %v187_v30 = vmul.f32 %v169_v49, %v69_v43 }
  0x3b   :  { %v184_v18 = vsub.f32 %v172_v3, %v182_v48  ;;  %v129_v22 = vadd.f32 %v127_v7, %v125_v14  ;;  %v191_v34 = vmul.f32 %v181_v56, %v362_v27 }
  0x3c   :  { %v173_v21 = vadd.f32 %v171_v0, %v153_v13  ;;  %v160_v26 = vadd.f32 %v158_v5, %v156_v20 }
  0x3d   :  { %v195_v17 = vadd.f32 %v194_v10, %v184_v18  ;;  %v157_v29 = vadd.f32 %v155_v19, %v129_v22 }
  0x3e   :  { %v185_v9 = vsub.f32 %v173_v21, %v183_v11  ;;  %v188_v31 = vadd.f32 %v186_v8, %v160_v26 }
  0x3f   :  { %197 = vst [vmem:[#allocation8] sm:$0xf] %v195_v17  ;;  %v161_v33 = vadd.f32 %v159_v15, %v157_v29 }
  0x40   :  { %v196_v23 = vadd.f32 %v194_v10, %v185_v9  ;;  %v192_v36 = vadd.f32 %v190_v28, %v188_v31 }
  0x41   :  { %v189_v24 = vadd.f32 %v187_v30, %v161_v33 }
  0x42   :  { %198 = vst [vmem:[#allocation8 + $0x4] sm:$0xf] %v196_v23  ;;  %v201_v37 = vadd.f32 %v200_v32, %v192_v36 }
  0x43   :  { %v193_v16 = vadd.f32 %v191_v34, %v189_v24 }
  0x44   :  { %204 = vst [vmem:[#allocation8 + $0x8] sm:$0xf] %v201_v37 }
  0x45   :  { %v202_v35 = vadd.f32 %v200_v32, %v193_v16 }
  0x47   :  { %205 = vst [vmem:[#allocation8 + $0xc] sm:$0xf] %v202_v35 }
  0x48   :  { %301 = shalt.err (!%p298_p5)
}
  0x49   :  { %217 = dma.vmem_to_hbm [thread:$0]  %s212_s2, 256, %s381_s3, [#allocation4], %s318_s17, %s318_s17, %s319_s18  }
  0x4a   :  { %314 = dma.done.wait [#allocation4], 256  }
  0x4b   :  { %315 = vsyncadd [#allocation4], 4294967040 }
  0x4c   :  { %221 = vsyncpa [#allocation3], 1 }
  0x4d   :  { %222 = vsyncpa [#allocation6], 1 }
  0x4e   :  { %223 = vsyncpa [#allocation4], 1 }

</bundles_post_ra>
